<compile_context>
chip_gen: v6e
topology: v6e:2x2x1
jax: 0.10.0
libtpu: 0.0.40
codegen_flags: <defaults>
</compile_context>

<pallas_src>
import functools

import jax
import jax.numpy as jnp
from jax.experimental import pallas as pl
from jax.experimental.pallas import tpu as pltpu


def _round_up(x, m):
    return ((x + m - 1) // m) * m


def _rnn_seq_kernel(x_ref, h0_ref, wx_ref, wh_ref, bi_ref, wo_ref, bo_ref,
                    out_ref, hfin_ref, *, output_size):
    """One RNN cell step; the grid axis iterates over timesteps.

    hfin_ref's index_map returns the same block for every grid step, so it is
    the VMEM-resident carry for the hidden state.
    """
    t = pl.program_id(0)

    @pl.when(t == 0)
    def _():
        hfin_ref[...] = h0_ref[...]

    h_prev = hfin_ref[...]

    # hidden = cat([x, h], 1) @ W_i2h + b   ==   x @ W_x + h @ W_h + b
    hidden_f32 = (
        jnp.dot(x_ref[...], wx_ref[...], preferred_element_type=jnp.float32)
        + jnp.dot(h_prev, wh_ref[...], preferred_element_type=jnp.float32)
        + bi_ref[...]
    )
    hidden = hidden_f32.astype(hfin_ref.dtype)

    # logits = hidden @ W_h2o + b   (f32 accumulation)
    logits = (
        jnp.dot(hidden, wo_ref[...], preferred_element_type=jnp.float32)
        + bo_ref[...]
    )

    # log_softmax over the valid (unpadded) output lanes, in f32.
    lane = jax.lax.broadcasted_iota(jnp.int32, logits.shape, 1)
    valid = lane < output_size
    logits_m = jnp.where(valid, logits, jnp.float32(-1e30))
    m = jnp.max(logits_m, axis=1, keepdims=True)
    shifted = logits_m - m
    lse = jnp.log(jnp.sum(jnp.exp(shifted), axis=1, keepdims=True))

    out_ref[...] = (shifted - lse).astype(out_ref.dtype)
    hfin_ref[...] = hidden


def rnn_sequence(x_seq, h0, w_i2h, b_i2h, w_h2o, b_h2o,
                 *, compute_dtype=jnp.float32):
    """Runs the RNN cell over a whole sequence in one fused Pallas kernel.

    x_seq : [T, B, input_size]                       float32
    h0    : [B, hidden_size]                         float32
    w_i2h : [input_size + hidden_size, hidden_size]  (pre-transposed vs torch)
    b_i2h : [1, hidden_size]
    w_h2o : [hidden_size, output_size]               (pre-transposed vs torch)
    b_h2o : [1, output_size]

    Returns (log_probs [T, B, output_size] f32, h_final [B, hidden_size] f32).
    """
    T, B, I = x_seq.shape
    H = h0.shape[1]
    O = w_h2o.shape[1]
    assert w_i2h.shape == (I + H, H)

    f32 = jnp.float32
    sub = 16 if compute_dtype == jnp.bfloat16 else 8   # sublane packing
    Bp = _round_up(B, sub)
    Ip = _round_up(I, 128)
    Hp = _round_up(H, 128)
    Op = _round_up(O, 128)

    # Split the concatenated i2h weight -> no in-kernel lane-axis concat.
    w_x = w_i2h[:I, :]
    w_h = w_i2h[I:, :]

    def pad2(a, r, c):
        return jnp.zeros((r, c), a.dtype).at[:a.shape[0], :a.shape[1]].set(a)

    x_p = jnp.zeros((T, Bp, Ip), f32).at[:, :B, :I].set(x_seq).astype(compute_dtype)
    h0_p = pad2(h0, Bp, Hp).astype(compute_dtype)
    wx_p = pad2(w_x, Ip, Hp).astype(compute_dtype)
    wh_p = pad2(w_h, Hp, Hp).astype(compute_dtype)
    wo_p = pad2(w_h2o, Hp, Op).astype(compute_dtype)
    bi_p = pad2(b_i2h.astype(f32), 1, Hp)   # biases stay f32 (added post-MXU)
    bo_p = pad2(b_h2o.astype(f32), 1, Op)

    def resident(shape):
        # Same block every grid step -> stays in VMEM across all timesteps.
        return pl.BlockSpec(shape, lambda t, _s=shape: (0,) * len(_s))

    kernel = functools.partial(_rnn_seq_kernel, output_size=O)

    out_p, hfin_p = pl.pallas_call(
        kernel,
        grid=(T,),
        in_specs=[
            pl.BlockSpec((None, Bp, Ip), lambda t: (t, 0, 0)),   # x[t]
            resident((Bp, Hp)),                                   # h0
            resident((Ip, Hp)),                                   # W_x
            resident((Hp, Hp)),                                   # W_h
            resident((1, Hp)),                                    # b_i2h
            resident((Hp, Op)),                                   # W_h2o
            resident((1, Op)),                                    # b_h2o
        ],
        out_specs=(
            pl.BlockSpec((None, Bp, Op), lambda t: (t, 0, 0)),    # log-probs[t]
            pl.BlockSpec((Bp, Hp), lambda t: (0, 0)),             # final hidden (carry)
        ),
        out_shape=(
            jax.ShapeDtypeStruct((T, Bp, Op), jnp.float32),
            jax.ShapeDtypeStruct((Bp, Hp), compute_dtype),
        ),
        compiler_params=pltpu.CompilerParams(
            dimension_semantics=("arbitrary",)),   # time axis carries state
    )(x_p, h0_p, wx_p, wh_p, bi_p, wo_p, bo_p)

    out = out_p[:, :B, :O]
    h_final = hfin_p[:B, :H].astype(jnp.float32)
    return out, h_final


def rnn_forward(x, h, w_i2h, b_i2h, w_h2o, b_h2o, *, compute_dtype=jnp.float32):
    """Single-step equivalent of RNN.forward(input, hidden) -> (output, hidden)."""
    out_seq, h_new = rnn_sequence(x[None], h, w_i2h, b_i2h, w_h2o, b_h2o,
                                  compute_dtype=compute_dtype)
    return out_seq[0], h_new


def init_params(key, input_size, hidden_size, output_size):
    """Deterministic init mimicking nn.Linear's uniform(-1/sqrt(fan_in), ...)."""
    k1, k2, k3, k4 = jax.random.split(key, 4)
    fan_i2h = input_size + hidden_size
    bound1 = 1.0 / jnp.sqrt(fan_i2h)
    bound2 = 1.0 / jnp.sqrt(hidden_size)
    # Stored already transposed: [in_features, out_features]
    w_i2h = jax.random.uniform(k1, (fan_i2h, hidden_size), jnp.float32,
                               -bound1, bound1)
    b_i2h = jax.random.uniform(k2, (1, hidden_size), jnp.float32,
                               -bound1, bound1)
    w_h2o = jax.random.uniform(k3, (hidden_size, output_size), jnp.float32,
                               -bound2, bound2)
    b_h2o = jax.random.uniform(k4, (1, output_size), jnp.float32,
                               -bound2, bound2)
    return w_i2h, b_i2h, w_h2o, b_h2o


# -------------------- pure-JAX references --------------------

def rnn_step_ref(x, h, w_i2h, b_i2h, w_h2o, b_h2o):
    combined = jnp.concatenate([x, h], axis=1)
    hidden = combined @ w_i2h + b_i2h
    logits = hidden @ w_h2o + b_h2o
    return jax.nn.log_softmax(logits, axis=1), hidden


def rnn_sequence_ref(x_seq, h0, w_i2h, b_i2h, w_h2o, b_h2o):
    def step(h, x):
        out, h_new = rnn_step_ref(x, h, w_i2h, b_i2h, w_h2o, b_h2o)
        return h_new, out
    h_final, outs = jax.lax.scan(step, h0, x_seq)
    return outs, h_final


if __name__ == "__main__":
    batch = 2
    seq_len = 8
    input_size = 16
    hidden_size = 32
    output_size = 10

    key = jax.random.PRNGKey(0)
    kx, kparams = jax.random.split(key)

    x_seq = jax.random.normal(kx, (seq_len, batch, input_size), jnp.float32)
    h0 = jnp.zeros((batch, hidden_size), jnp.float32)   # initHidden()

    w_i2h, b_i2h, w_h2o, b_h2o = init_params(kparams, input_size,
                                             hidden_size, output_size)

    out_ref_seq, h_ref_final = rnn_sequence_ref(x_seq, h0, w_i2h, b_i2h,
                                                w_h2o, b_h2o)

    # Fused full-sequence kernel, f32 MXU path (v5e-friendly).
    out_f32, h_f32 = rnn_sequence(x_seq, h0, w_i2h, b_i2h, w_h2o, b_h2o,
                                  compute_dtype=jnp.float32)
    out_f32 = jax.block_until_ready(out_f32)
    h_f32 = jax.block_until_ready(h_f32)
    assert out_f32.shape == (seq_len, batch, output_size)
    assert h_f32.shape == (batch, hidden_size)
    assert jnp.allclose(out_f32, out_ref_seq, atol=1e-4, rtol=1e-4)
    assert jnp.allclose(h_f32, h_ref_final, atol=1e-4, rtol=1e-4)

    # bf16 MXU path (v6e/v7x peak); accumulation + log_softmax stay f32.
    out_bf16, h_bf16 = rnn_sequence(x_seq, h0, w_i2h, b_i2h, w_h2o, b_h2o,
                                    compute_dtype=jnp.bfloat16)
    out_bf16 = jax.block_until_ready(out_bf16)
    h_bf16 = jax.block_until_ready(h_bf16)
    assert jnp.allclose(out_bf16, out_ref_seq, atol=3e-1, rtol=3e-1)
    assert jnp.allclose(h_bf16, h_ref_final, atol=3e-1, rtol=3e-1)

    # Single-step call matching RNN.forward(input, hidden) -> (output, hidden).
    out1, h1 = rnn_forward(x_seq[0], h0, w_i2h, b_i2h, w_h2o, b_h2o)
    out1 = jax.block_until_ready(out1)
    out1_ref, h1_ref = rnn_step_ref(x_seq[0], h0, w_i2h, b_i2h, w_h2o, b_h2o)
    assert jnp.allclose(out1, out1_ref, atol=1e-4, rtol=1e-4)
    assert jnp.allclose(h1, h1_ref, atol=1e-4, rtol=1e-4)

    print("KERNEL_OK")
</pallas_src>

<mosaic_0001>
module attributes {stable_mosaic.version = 11 : i64} {
  func.func @_rnn_seq_kernel(%arg0: i32, %arg1: memref<1x8x128xf32, #tpu.memory_space<vmem>>, %arg2: memref<8x128xf32, #tpu.memory_space<vmem>>, %arg3: memref<128x128xf32, #tpu.memory_space<vmem>>, %arg4: memref<128x128xf32, #tpu.memory_space<vmem>>, %arg5: memref<1x128xf32, #tpu.memory_space<vmem>>, %arg6: memref<128x128xf32, #tpu.memory_space<vmem>>, %arg7: memref<1x128xf32, #tpu.memory_space<vmem>>, %arg8: memref<1x8x128xf32, #tpu.memory_space<vmem>>, %arg9: memref<8x128xf32, #tpu.memory_space<vmem>>) attributes {dimension_semantics = [#tpu.dimension_semantics<arbitrary>], iteration_bounds = array<i64: 8>, scalar_prefetch = 0 : i64, scratch_operands = 0 : i64, tpu.core_type = #tpu.core_type<tc>, window_params = [{transform_indices = @transform_0, window_bounds = array<i64: 1, 8, 128>}, {pipeline_mode = #tpu.pipeline_mode<synchronous>, transform_indices = @transform_1, window_bounds = array<i64: 8, 128>}, {pipeline_mode = #tpu.pipeline_mode<synchronous>, transform_indices = @transform_2, window_bounds = array<i64: 128, 128>}, {pipeline_mode = #tpu.pipeline_mode<synchronous>, transform_indices = @transform_3, window_bounds = array<i64: 128, 128>}, {pipeline_mode = #tpu.pipeline_mode<synchronous>, transform_indices = @transform_4, window_bounds = array<i64: 1, 128>}, {pipeline_mode = #tpu.pipeline_mode<synchronous>, transform_indices = @transform_5, window_bounds = array<i64: 128, 128>}, {pipeline_mode = #tpu.pipeline_mode<synchronous>, transform_indices = @transform_6, window_bounds = array<i64: 1, 128>}, {transform_indices = @transform_7, window_bounds = array<i64: 1, 8, 128>}, {pipeline_mode = #tpu.pipeline_mode<synchronous>, transform_indices = @transform_8, window_bounds = array<i64: 8, 128>}]} {
    %c0_i32 = arith.constant 0 : i32
    %0 = arith.cmpi eq, %arg0, %c0_i32 : i32
    %1 = arith.extui %0 : i1 to i32
    %c0_i32_0 = arith.constant 0 : i32
    %2 = arith.cmpi ne, %1, %c0_i32_0 : i32
    scf.if %2 {
      %c0_25 = arith.constant 0 : index
      %c0_26 = arith.constant 0 : index
      %38 = vector.load %arg2[%c0_25, %c0_26] : memref<8x128xf32, #tpu.memory_space<vmem>>, vector<8x128xf32>
      %c0_27 = arith.constant 0 : index
      %c0_28 = arith.constant 0 : index
      %39 = vector.load %arg9[%c0_27, %c0_28] : memref<8x128xf32, #tpu.memory_space<vmem>>, vector<8x128xf32>
      tpu.vector_store %arg9[%c0_27, %c0_28], %38 {strides = array<i32>} : memref<8x128xf32, #tpu.memory_space<vmem>>, vector<8x128xf32>,
    } else {
    }
    %c0 = arith.constant 0 : index
    %c0_1 = arith.constant 0 : index
    %3 = vector.load %arg9[%c0, %c0_1] : memref<8x128xf32, #tpu.memory_space<vmem>>, vector<8x128xf32>
    %c0_2 = arith.constant 0 : index
    %c0_3 = arith.constant 0 : index
    %c0_4 = arith.constant 0 : index
    %4 = vector.load %arg1[%c0_2, %c0_3, %c0_4] : memref<1x8x128xf32, #tpu.memory_space<vmem>>, vector<1x8x128xf32>
    %5 = vector.shape_cast %4 : vector<1x8x128xf32> to vector<8x128xf32>
    %c0_5 = arith.constant 0 : index
    %c0_6 = arith.constant 0 : index
    %6 = vector.load %arg3[%c0_5, %c0_6] : memref<128x128xf32, #tpu.memory_space<vmem>>, vector<128x128xf32>
    %cst = arith.constant dense<0.000000e+00> : vector<8x128xf32>
    %7 = tpu.matmul %5, %6, %cst {dimension_numbers = #tpu.dot_dimension_numbers<[1], [0], [0], [1], [0, 0, 1, 1], [], []>} : vector<8x128xf32>, vector<128x128xf32>, vector<8x128xf32> -> vector<8x128xf32>
    %c0_7 = arith.constant 0 : index
    %c0_8 = arith.constant 0 : index
    %8 = vector.load %arg4[%c0_7, %c0_8] : memref<128x128xf32, #tpu.memory_space<vmem>>, vector<128x128xf32>
    %cst_9 = arith.constant dense<0.000000e+00> : vector<8x128xf32>
    %9 = tpu.matmul %3, %8, %cst_9 {dimension_numbers = #tpu.dot_dimension_numbers<[1], [0], [0], [1], [0, 0, 1, 1], [], []>} : vector<8x128xf32>, vector<128x128xf32>, vector<8x128xf32> -> vector<8x128xf32>
    %10 = arith.addf %7, %9 : vector<8x128xf32>
    %c0_10 = arith.constant 0 : index
    %c0_11 = arith.constant 0 : index
    %11 = vector.load %arg5[%c0_10, %c0_11] : memref<1x128xf32, #tpu.memory_space<vmem>>, vector<1x128xf32>
    %12 = vector.broadcast %11 : vector<1x128xf32> to vector<8x128xf32>
    %13 = arith.addf %10, %12 : vector<8x128xf32>
    %c0_12 = arith.constant 0 : index
    %c0_13 = arith.constant 0 : index
    %14 = vector.load %arg6[%c0_12, %c0_13] : memref<128x128xf32, #tpu.memory_space<vmem>>, vector<128x128xf32>
    %cst_14 = arith.constant dense<0.000000e+00> : vector<8x128xf32>
    %15 = tpu.matmul %13, %14, %cst_14 {dimension_numbers = #tpu.dot_dimension_numbers<[1], [0], [0], [1], [0, 0, 1, 1], [], []>} : vector<8x128xf32>, vector<128x128xf32>, vector<8x128xf32> -> vector<8x128xf32>
    %c0_15 = arith.constant 0 : index
    %c0_16 = arith.constant 0 : index
    %16 = vector.load %arg7[%c0_15, %c0_16] : memref<1x128xf32, #tpu.memory_space<vmem>>, vector<1x128xf32>
    %17 = vector.broadcast %16 : vector<1x128xf32> to vector<8x128xf32>
    %18 = arith.addf %15, %17 : vector<8x128xf32>
    %19 = tpu.iota {dimensions = array<i32: 1>} : vector<8x128xi32>
    %c10_i32 = arith.constant 10 : i32
    %20 = vector.broadcast %c10_i32 : i32 to vector<8x128xi32>
    %21 = arith.cmpi slt, %19, %20 : vector<8x128xi32>
    %cst_17 = arith.constant -1.000000e+30 : f32
    %22 = vector.broadcast %cst_17 : f32 to vector<8x128xf32>
    %23 = arith.select %21, %18, %22 : vector<8x128xi1>, vector<8x128xf32>
    %cst_18 = arith.constant dense<0xFF800000> : vector<8xf32>
    %24 = vector.multi_reduction <maximumf>, %23, %cst_18 [1] : vector<8x128xf32> to vector<8xf32>
    %25 = vector.shape_cast %24 : vector<8xf32> to vector<8x1xf32>
    %26 = vector.broadcast %25 : vector<8x1xf32> to vector<8x128xf32>
    %27 = arith.subf %23, %26 : vector<8x128xf32>
    %28 = math.exp %27 : vector<8x128xf32>
    %cst_19 = arith.constant dense<0.000000e+00> : vector<8xf32>
    %29 = vector.multi_reduction <add>, %28, %cst_19 [1] : vector<8x128xf32> to vector<8xf32>
    %30 = vector.shape_cast %29 : vector<8xf32> to vector<8x1xf32>
    %31 = math.log %30 : vector<8x1xf32>
    %32 = vector.broadcast %31 : vector<8x1xf32> to vector<8x128xf32>
    %33 = arith.subf %27, %32 : vector<8x128xf32>
    %c0_20 = arith.constant 0 : index
    %c0_21 = arith.constant 0 : index
    %c0_22 = arith.constant 0 : index
    %34 = vector.load %arg8[%c0_20, %c0_21, %c0_22] : memref<1x8x128xf32, #tpu.memory_space<vmem>>, vector<1x8x128xf32>
    %35 = vector.shape_cast %34 : vector<1x8x128xf32> to vector<8x128xf32>
    %36 = vector.shape_cast %33 : vector<8x128xf32> to vector<1x8x128xf32>
    tpu.vector_store %arg8[%c0_20, %c0_21, %c0_22], %36 {strides = array<i32>} : memref<1x8x128xf32, #tpu.memory_space<vmem>>, vector<1x8x128xf32>,
    %c0_23 = arith.constant 0 : index
    %c0_24 = arith.constant 0 : index
    %37 = vector.load %arg9[%c0_23, %c0_24] : memref<8x128xf32, #tpu.memory_space<vmem>>, vector<8x128xf32>
    tpu.vector_store %arg9[%c0_23, %c0_24], %13 {strides = array<i32>} : memref<8x128xf32, #tpu.memory_space<vmem>>, vector<8x128xf32>,
    return
  }
  func.func @transform_0(%arg0: i32) -> (i32, i32, i32) {
    %c0_i32 = arith.constant 0 : i32
    %c0_i32_0 = arith.constant 0 : i32
    %c0_i32_1 = arith.constant 0 : i32
    return %arg0, %c0_i32, %c0_i32_0 : i32, i32, i32
  }
  func.func @transform_1(%arg0: i32) -> (i32, i32) {
    %c0_i32 = arith.constant 0 : i32
    %c0_i32_0 = arith.constant 0 : i32
    %c0_i32_1 = arith.constant 0 : i32
    return %c0_i32, %c0_i32_0 : i32, i32
  }
  func.func @transform_2(%arg0: i32) -> (i32, i32) {
    %c0_i32 = arith.constant 0 : i32
    %c0_i32_0 = arith.constant 0 : i32
    %c0_i32_1 = arith.constant 0 : i32
    return %c0_i32, %c0_i32_0 : i32, i32
  }
  func.func @transform_3(%arg0: i32) -> (i32, i32) {
    %c0_i32 = arith.constant 0 : i32
    %c0_i32_0 = arith.constant 0 : i32
    %c0_i32_1 = arith.constant 0 : i32
    return %c0_i32, %c0_i32_0 : i32, i32
  }
  func.func @transform_4(%arg0: i32) -> (i32, i32) {
    %c0_i32 = arith.constant 0 : i32
    %c0_i32_0 = arith.constant 0 : i32
    %c0_i32_1 = arith.constant 0 : i32
    return %c0_i32, %c0_i32_0 : i32, i32
  }
  func.func @transform_5(%arg0: i32) -> (i32, i32) {
    %c0_i32 = arith.constant 0 : i32
    %c0_i32_0 = arith.constant 0 : i32
    %c0_i32_1 = arith.constant 0 : i32
    return %c0_i32, %c0_i32_0 : i32, i32
  }
  func.func @transform_6(%arg0: i32) -> (i32, i32) {
    %c0_i32 = arith.constant 0 : i32
    %c0_i32_0 = arith.constant 0 : i32
    %c0_i32_1 = arith.constant 0 : i32
    return %c0_i32, %c0_i32_0 : i32, i32
  }
  func.func @transform_7(%arg0: i32) -> (i32, i32, i32) {
    %c0_i32 = arith.constant 0 : i32
    %c0_i32_0 = arith.constant 0 : i32
    %c0_i32_1 = arith.constant 0 : i32
    return %arg0, %c0_i32, %c0_i32_0 : i32, i32, i32
  }
  func.func @transform_8(%arg0: i32) -> (i32, i32) {
    %c0_i32 = arith.constant 0 : i32
    %c0_i32_0 = arith.constant 0 : i32
    %c0_i32_1 = arith.constant 0 : i32
    return %c0_i32, %c0_i32_0 : i32, i32
  }
}

</mosaic_0001>

<bundles_post_ra>
// kernel: tpu_custom_call.1
= control target key start
LH: loop header
LB: loop body
LE: loop exit
PB: predicated region body
PF: predicated region fallthrough
CT: control target
= control target key end

     0   :  { %s1671_s0 = inlined_call_operand.hbm [shape: f32[8,8,128], index: 0, kind: input, shape index: {}]   ;;  %s1672_s1 = inlined_call_operand.hbm [shape: f32[8,128], index: 1, kind: input, shape index: {}]   ;;  %s1673_s2 = inlined_call_operand.hbm [shape: f32[128,128], index: 2, kind: input, shape index: {}]   ;;  %s1674_s3 = inlined_call_operand.hbm [shape: f32[128,128], index: 3, kind: input, shape index: {}]   ;;  %s1675_s4 = inlined_call_operand.vmem [shape: f32[1,128], index: 4, kind: input, shape index: {}]   ;;  %s1676_s5 = inlined_call_operand.hbm [shape: f32[128,128], index: 5, kind: input, shape index: {}]   ;;  %s1677_s6 = inlined_call_operand.vmem [shape: f32[1,128], index: 6, kind: input, shape index: {}]   ;;  %s1678_s7 = inlined_call_operand.hbm [shape: f32[8,8,128], index: 7, kind: output, shape index: {0}]   ;;  %s1679_s8 = inlined_call_operand.hbm [shape: f32[8,128], index: 8, kind: output, shape index: {1}]  }
   0x1   :  { %1685 = sst [smem:[#allocation19_spill]] %s1672_s1 }
   0x2   :  { %1686 = sst [smem:[#allocation20_spill]] %s1673_s2 }
   0x3   :  { %1687 = sst [smem:[#allocation21_spill]] %s1674_s3 }
   0x4   :  { %14 = vsyncpa [#allocation3], 0 }
   0x5   :  { %16 = vsyncpa [#allocation3 + $0x1], 0 }
   0x6   :  { %17 = vsyncpa [#allocation6], 0 }
   0x7   :  { %18 = vsyncpa [#allocation9], 0 }
   0x8   :  { %19 = vsyncpa [#allocation4], 0 }
   0x9   :  { %21 = vsyncpa [#allocation4 + $0x1], 0 }
   0xa   :  { %22 = vsyncpa [#allocation13], 0  ;;  %s1390_s27 = smov 0   ;;  %s1392_s28 = smov 0  }
   0xb   :  { %s1394_s29 = smov 0   ;;  %s1396_s30 = smov 0  }
   0xc LB: > { %s1334_s9 = smov [#allocation5]   ;;  %s1411_s11 = sadd.s32 4294967295, %s1332_s30   ;;  %s1332_s30 = sphi %s1396_s30, %s1714_s30   ;;  %s1328_s29 = sphi %s1394_s29, %s1713_s29   ;;  %s1324_s28 = sphi %s1392_s28, %s1712_s28   ;;  %s1320_s27 = sphi %s1390_s27, %s1711_s27  }
   0xd   : > { %s245_s10 = sshll.u32 %s1334_s9, 4  ;;  %p818_p0 = scmp.ge.s32.totalorder %s1332_s30, 1  ;;  %s246_s10 = int_to_ptr.vmem [resolvable:$true] %s245_s10 }
   0xe   : > { %p1681_p1 = scmp.eq.s32.totalorder %s1411_s11, 0  ;;  %p232_p2 = scmp.lt.s32.totalorder %s1332_s30, 9 }
   0xf   : > { %s1335_s13 = smov [#allocation8]   ;;  %s1336_s16 = smov [#allocation7]  }
  0x10   : > { %p1417_p4 = pnand %p818_p0, %p232_p2  ;;  %s268_s14 = sshll.u32 %s1335_s13, 4  ;;  %s1429_s14 = int_to_ptr.vmem [resolvable:$true] %s268_s14 }
  0x11   : > { %s255_s17 = sshll.u32 %s1336_s16, 4  ;;  %s1111_s18 = scalar_lea.vmem %s246_s10, 128  ;;  %s1431_s17 = int_to_ptr.vmem [resolvable:$true] %s255_s17 }
  0x12   : > { %s1688_s12 = scalar_select %p1417_p4, 1, 0 }
  0x13   : > { %p1022_p5 = pneg %p1417_p4  ;;  %p1112_p8 = scmp.ne.s32.totalorder %s246_s10, %s1111_s18 }
  0x14   : > { %p1119_p11 = scmp.lt.s32.totalorder %s246_s10, %s246_s10  ;;  %p1120_p12 = scmp.lt.s32.totalorder %s1111_s18, %s1111_s18 }
  0x15   : > { %p1425_p6 = pnand %p1022_p5, %p1681_p1 }
  0x16   : > { %p1121_p13 = por %p1120_p12, %p1119_p11 }
  0x17   : > { %p1102_p7 = pneg %p1425_p6 }
  0x19   : > { %p1114_p9 = pnand %p1112_p8, %p1102_p7 }
  0x1b   : > { %p1115_p10 = pneg %p1114_p9 }
  0x1d   : > { %p1122_p0 = pnand %p1121_p13, %p1115_p10 }
  0x1f   : > { %1125 = shalt.err (!%p1122_p0)
}
  0x20   : > { %s1690_s1 = sld [smem:[#allocation19_spill]]  ;;  %s1137_s21 = scalar_lea.vmem %s1429_s14, 2048 }
  0x21   : > { %p1138_p2 = scmp.ne.s32.totalorder %s1429_s14, %s1137_s21  ;;  %p1145_p9 = scmp.lt.s32.totalorder %s1429_s14, %s1429_s14 }
  0x22   : > { %p1146_p10 = scmp.lt.s32.totalorder %s1137_s21, %s1137_s21 }
  0x23   : > { %p1140_p5 = pnand %p1138_p2, %p1102_p7 }
  0x24   : > { %p1147_p11 = por %p1146_p10, %p1145_p9 }
  0x25   : > { %p1141_p8 = pneg %p1140_p5 }
  0x26   : > { %1025 = dma.hbm_to_vmem [thread:$0]  (!%p1425_p6), %s1690_s1, 128, %s246_s10, [#allocation6]  }
  0x27   : > { %p1148_p12 = pnand %p1147_p11, %p1141_p8 }
  0x29   : > { %1151 = shalt.err (!%p1148_p12)
}
  0x2a   : > { %s1337_s22 = smov 128   ;;  %s1338_s23 = smov 8  }
  0x2b   : > { %s1691_s3 = sld [smem:[#allocation21_spill]]  ;;  %s1163_s26 = scalar_lea.vmem %s1431_s17, 2048 }
  0x2c   : > { %p1164_p13 = scmp.ne.s32.totalorder %s1431_s17, %s1163_s26  ;;  %p1171_p5 = scmp.lt.s32.totalorder %s1431_s17, %s1431_s17 }
  0x2d   : > { %p1172_p8 = scmp.lt.s32.totalorder %s1163_s26, %s1163_s26 }
  0x2e   : > { %p1166_p0 = pnand %p1164_p13, %p1102_p7 }
  0x2f   : > { %p1173_p9 = por %p1172_p8, %p1171_p5 }
  0x30   : > { %p1167_p2 = pneg %p1166_p0 }
  0x31   : > { %1031 = dma.hbm_to_vmem [thread:$0]  (!%p1425_p6), %s1691_s3, 2048, %s1429_s14, [#allocation9], %s1337_s22, %s1337_s22, %s1338_s23  }
  0x32   : > { %p1174_p10 = pnand %p1173_p9, %p1167_p2 }
  0x34   : > { %1177 = shalt.err (!%p1174_p10)
}
  0x35   : > { %s1692_s2 = sld [smem:[#allocation20_spill]]  ;;  %s1339_s13 = smov [#allocation10]  }
  0x36   : > { %s284_s14 = sshll.u32 %s1339_s13, 4  ;;  %s285_s14 = int_to_ptr.vmem [resolvable:$true] %s284_s14 }
  0x37   : > { %s1189_s16 = scalar_lea.vmem %s285_s14, 2048  ;;  %p1197_p0 = scmp.lt.s32.totalorder %s285_s14, %s285_s14 }
  0x38   : > { %p1190_p11 = scmp.ne.s32.totalorder %s285_s14, %s1189_s16  ;;  %p1198_p2 = scmp.lt.s32.totalorder %s1189_s16, %s1189_s16 }
  0x3a   : > { %p1192_p12 = pnand %p1190_p11, %p1102_p7  ;;  %p1199_p5 = por %p1198_p2, %p1197_p0 }
  0x3b   : > { %1028 = dma.hbm_to_vmem [thread:$0]  (!%p1425_p6), %s1692_s2, 2048, %s1431_s17, [#allocation6], %s1337_s22, %s1337_s22, %s1338_s23  }
  0x3c   : > { %p1193_p13 = pneg %p1192_p12 }
  0x3e   : > { %p1200_p8 = pnand %p1199_p5, %p1193_p13 }
  0x40   : > { %1203 = shalt.err (!%p1200_p8)
}
  0x41   : > { %1034 = dma.hbm_to_vmem [thread:$0]  (!%p1425_p6), %s1676_s5, 2048, %s285_s14, [#allocation9], %s1337_s22, %s1337_s22, %s1338_s23  }
  0x42   : > { %s817_s15 = sadd.s32 4294967294, %s1332_s30   ;;  %s1479_s17 = sadd.s32 1, %s1332_s30  }
  0x43   : > { %s32_s20 = ssub.s32 %s1332_s30, %s1479_s17  ;;  %s35_s21 = sadd.s32 1, %s1328_s29 }
  0x44   : > { %p33_p7 = scmp.eq.s32.totalorder %s32_s20, 0  ;;  %p42_p9 = scmp.ne.s32.totalorder %s1328_s29, %s1324_s28 }
  0x45   : > { %p43_p10 = scmp.eq.s32.totalorder %s1332_s30, 0  ;;  %p48_p11 = scmp.ne.s32.totalorder %s1324_s28, %s1320_s27 }
  0x46   : > { %s1490_s24 = scalar_select %p33_p7, %s1328_s29, %s35_s21  }
  0x47   : > { %p1492_p12 = por %p43_p10, %p42_p9  ;;  %p1498_p6 = por %p1681_p1, %p48_p11 }
  0x48   : > { %p1680_p13 = scmp.eq.s32.totalorder %s1411_s11, 7  ;;  %p204_p0 = scmp.eq.s32.totalorder %s817_s15, 7 }
  0x49   : > { %s1694_s22 = scalar_select %p1498_p6, 1, 0 }
  0x4a   : > { %p1047_p2 = scmp.lt.s32.totalorder %s1332_s30, 8  ;;  %s301_s23 = sand.u32 1, %s1328_s29  }
  0x4b   : > { %p1507_p5 = por %p1680_p13, %p42_p9  ;;  %p1511_p8 = por %p204_p0, %p48_p11 }
  0x4c   : > { %s824_s10 = sshll.u32 %s301_s23, 3  ;;  %s825_s13 = sshll.u32 %s1332_s30, 7 }
  0x4d   : > { %s1695_s26 = scalar_select %p1507_p5, 1, 0 }
  0x4e   : > { %s1696_s9 = scalar_select %p1511_p8, 1, 0 }
  0x4f   : > { %s1519_s18 = scalar_lea.hbm %s1671_s0, %s825_s13  ;;  %s305_s19 = scalar_lea.vmem [#allocation2], %s824_s10 }
  0x50   : > { %s312_s15 = sshll.u32 %s305_s19, 4  ;;  %p1523_p7 = pnand %p1047_p2, %p1492_p12  ;;  %s313_s15 = int_to_ptr.vmem [resolvable:$true] %s312_s15 }
  0x51   : > { %s302_s21 = scalar_lea.sflag [#allocation3], %s301_s23  ;;  %s1204_s1 = scalar_lea.hbm %s1519_s18, 128 }
  0x52   : > { %p1205_p9 = scmp.ne.s32.totalorder %s1519_s18, %s1204_s1  ;;  %p1206_p10 = pneg %p1523_p7 }
  0x53   : > { %s1209_s16 = scalar_lea.hbm %s1671_s0, 1024  ;;  %p1210_p13 = scmp.lt.s32.totalorder %s1519_s18, %s1671_s0 }
  0x54   : > { %p1207_p11 = pnand %p1206_p10, %p1205_p9  ;;  %p1211_p12 = scmp.lt.s32.totalorder %s1209_s16, %s1204_s1 }
  0x56   : > { %p1208_p0 = pneg %p1207_p11  ;;  %p1212_p2 = por %p1211_p12, %p1210_p13 }
  0x58   : > { %p1213_p3 = pnand %p1212_p2, %p1208_p0 }
  0x5a   : > { %1216 = shalt.err (!%p1213_p3)
}
  0x5b   : > { %s1217_s25 = scalar_lea.vmem %s313_s15, 128  ;;  %s1340_s23 = smov [#allocation2]  }
  0x5c   : > { %p1218_p1 = scmp.ne.s32.totalorder %s313_s15, %s1217_s25  ;;  %s1222_s2 = sshll.u32 %s1340_s23, 4  ;;  %s1223_s2 = int_to_ptr.vmem [resolvable:$false] %s1222_s2 }
  0x5d   : > { %s1224_s3 = scalar_lea.vmem %s1223_s2, 256  ;;  %p1225_p9 = scmp.lt.s32.totalorder %s313_s15, %s1223_s2 }
  0x5e   : > { %p1220_p8 = pnand %p1218_p1, %p1206_p10  ;;  %p1226_p11 = scmp.lt.s32.totalorder %s1224_s3, %s1217_s25 }
  0x60   : > { %p1221_p5 = pneg %p1220_p8  ;;  %p1227_p6 = por %p1226_p11, %p1225_p9 }
  0x62   : > { %p1228_p4 = pnand %p1227_p6, %p1221_p5 }
  0x64   : > { %1231 = shalt.err (!%p1228_p4)
}
  0x65   : > { %1038 = dma.hbm_to_vmem [thread:$0]  (!%p1523_p7), %s1519_s18, 128, %s313_s15, %s302_s21  }
  0x66   : > { %p1698_p13 = scmp.ne.s32.totalorder %s1688_s12, 0 }
  0x67   : > { %s1544_s1 = sand.u32 (!%p1698_p13), 1, %s1324_s28   ;;  %p1699_p1 = scmp.ne.s32.totalorder (!%p1698_p13), %s1694_s22, 0 }
  0x68   : > { %321 = sbr.rel (%p1698_p13) target bundleno = 882 (0x372), region = 48  ;;  %s827_s13 = sshll.u32 (!%p1698_p13), %s1544_s1, 3 }
  0x69   : > { %s324_s14 = scalar_lea.sflag (!%p1698_p13), [#allocation3], %s1544_s1  ;;  %s1548_s2 = scalar_lea.vmem (!%p1698_p13), [#allocation2], %s827_s13 }
  0x6d   : > { %1299 = dma.done.wait (%p1699_p1), %s324_s14, 128  }
  0x6e   : > { %1301 = vsyncadd (%p1699_p1), %s324_s14, 4294967168  ;;  %p1700_p3 = scmp.eq.s32.totalorder %s1411_s11, 0 }
  0x70   : > { %1303 = dma.done.wait (%p1700_p3), [#allocation6], 2176   ;;  %p1701_p4 = pmov %p1700_p3 }
  0x71   : > { %p1702_p6 = pmov %p1700_p3 }
  0x72   : > { %1305 = vsyncadd (%p1701_p4), [#allocation6], 4294965120 }
  0x73   : > { %1307 = dma.done.wait (%p1702_p6), [#allocation9], 4096   ;;  %p1703_p5 = pmov %p1700_p3 }
  0x74   : > { %s1562_s3 = scalar_lea.vmem [#allocation11], %s827_s13  ;;  %p1704_p8 = scmp.ne.s32.totalorder %s1411_s11, 0 }
  0x75   : > { %1309 = vsyncadd (%p1703_p5), [#allocation9], 4294963200 }
  0x76   : > { %379 = sbr.rel (%p1704_p8) target bundleno = 125 (0x7d), region = 72 }
  0x7b   : > { %v380_v0 = vld [vmem:[#allocation5] sm:$0xff] }
  0x7c   : > { %381 = vst [vmem:[#allocation12] sm:$0xff] %v380_v0 }
  0x7d PF: > { %v415_v1 = vld [vmem:[#allocation8 + $0x78] sm:$0xff]  ;;  %v1341_v3 = vmov 0.0   ;;  %v414_v4 = vld [vmem:[#allocation8 + $0x70] sm:$0xff]  ;;  %v413_v6 = vld [vmem:[#allocation8 + $0x68] sm:$0xff]  ;;  %vm1342_vm0 = vmmov 0   ;;  %v657_v59 = vlaneseq  ;;  %s1343_s20 = smov [#allocation12]  }
  0x7e   : > { %v399_v2 = vld [vmem:[#allocation7 + $0x78] sm:$0xff]  ;;  %893 = vmatprep.subr.mxu0 %v1341_v3  ;;  %928 = vmatprep.subr.mxu1 %v1341_v3  ;;  %v398_v5 = vld [vmem:[#allocation7 + $0x70] sm:$0xff]  ;;  %v397_v7 = vld [vmem:[#allocation7 + $0x68] sm:$0xff]  ;;  %s698_s21 = sshll.u32 %s1343_s20, 4  ;;  %p1705_p10 = scmp.eq.s32.totalorder %s1411_s11, 7  ;;  %s699_s21 = int_to_ptr.vmem [resolvable:$true] %s698_s21 }
  0x7f   : > { %894 = vmatpush3.msra.mxu0 %v415_v1  ;;  %929 = vmatpush3.msra.mxu1 %v399_v2  ;;  %v412_v8 = vld [vmem:[#allocation8 + $0x60] sm:$0xff]  ;;  %v411_v10 = vld [vmem:[#allocation8 + $0x58] sm:$0xff]  ;;  %v410_v12 = vld [vmem:[#allocation8 + $0x50] sm:$0xff]  ;;  %v658_v60 = vand.u32 127, %v657_v59  ;;  %s1232_s16 = scalar_lea.vmem %s699_s21, 128  ;;  %p1239_p2 = scmp.lt.s32.totalorder %s699_s21, %s699_s21 }
  0x80   : > { %895 = vmatprep.subr.mxu0 %v1341_v3  ;;  %930 = vmatprep.subr.mxu1 %v1341_v3  ;;  %v396_v9 = vld [vmem:[#allocation7 + $0x60] sm:$0xff]  ;;  %v395_v11 = vld [vmem:[#allocation7 + $0x58] sm:$0xff]  ;;  %v394_v13 = vld [vmem:[#allocation7 + $0x50] sm:$0xff]  ;;  %p1233_p7 = scmp.ne.s32.totalorder %s699_s21, %s1232_s16  ;;  %p1240_p9 = scmp.lt.s32.totalorder %s1232_s16, %s1232_s16 }
  0x81   : > { %896 = vmatpush3.msra.mxu0 %v414_v4  ;;  %931 = vmatpush3.msra.mxu1 %v398_v5  ;;  %v409_v14 = vld [vmem:[#allocation8 + $0x48] sm:$0xff]  ;;  %v408_v16 = vld [vmem:[#allocation8 + $0x40] sm:$0xff]  ;;  %v407_v18 = vld [vmem:[#allocation8 + $0x38] sm:$0xff]  ;;  %vm659_vm1 = vcmp.lt.s32.totalorder %v658_v60, 10 }
  0x82   : > { %897 = vmatprep.subr.mxu0 %v1341_v3  ;;  %932 = vmatprep.subr.mxu1 %v1341_v3  ;;  %v393_v15 = vld [vmem:[#allocation7 + $0x48] sm:$0xff]  ;;  %v392_v17 = vld [vmem:[#allocation7 + $0x40] sm:$0xff]  ;;  %v391_v19 = vld [vmem:[#allocation7 + $0x38] sm:$0xff]  ;;  %p1234_p0 = pnand %p1233_p7, %p1705_p10  ;;  %p1241_p11 = por %p1240_p9, %p1239_p2 }
  0x83   : > { %898 = vmatpush3.msra.mxu0 %v413_v6  ;;  %933 = vmatpush3.msra.mxu1 %v397_v7  ;;  %v406_v20 = vld [vmem:[#allocation8 + $0x30] sm:$0xff]  ;;  %v405_v22 = vld [vmem:[#allocation8 + $0x28] sm:$0xff]  ;;  %v404_v24 = vld [vmem:[#allocation8 + $0x20] sm:$0xff] }
  0x84   : > { %899 = vmatprep.subr.mxu0 %v1341_v3  ;;  %934 = vmatprep.subr.mxu1 %v1341_v3  ;;  %v390_v21 = vld [vmem:[#allocation7 + $0x30] sm:$0xff]  ;;  %v389_v23 = vld [vmem:[#allocation7 + $0x28] sm:$0xff]  ;;  %v388_v25 = vld [vmem:[#allocation7 + $0x20] sm:$0xff]  ;;  %p1235_p12 = pneg %p1234_p0 }
  0x85   : > { %900 = vmatpush3.msra.mxu0 %v412_v8  ;;  %935 = vmatpush3.msra.mxu1 %v396_v9  ;;  %v403_v26 = vld [vmem:[#allocation8 + $0x18] sm:$0xff]  ;;  %v402_v28 = vld [vmem:[#allocation8 + $0x10] sm:$0xff]  ;;  %v401_v30 = vld [vmem:[#allocation8 + $0x8] sm:$0xff] }
  0x86   : > { %901 = vmatprep.subr.mxu0 %v1341_v3  ;;  %936 = vmatprep.subr.mxu1 %v1341_v3  ;;  %v387_v27 = vld [vmem:[#allocation7 + $0x18] sm:$0xff]  ;;  %v386_v29 = vld [vmem:[#allocation7 + $0x10] sm:$0xff]  ;;  %v385_v31 = vld [vmem:[#allocation7 + $0x8] sm:$0xff]  ;;  %p1242_p13 = pnand %p1241_p11, %p1235_p12 }
  0x87   : > { %902 = vmatpush3.msra.mxu0 %v411_v10  ;;  %937 = vmatpush3.msra.mxu1 %v395_v11  ;;  %v400_v32 = vld [vmem:[#allocation8] sm:$0xff]  ;;  %v382_v34 = vld [vmem:[#allocation12] sm:$0xff]  ;;  %v579_v36 = vld [vmem:[#allocation10 + $0x78] sm:$0xff] }
  0x88   : > { %903 = vmatprep.subr.mxu0 %v1341_v3  ;;  %938 = vmatprep.subr.mxu1 %v1341_v3  ;;  %v384_v33 = vld [vmem:[#allocation7] sm:$0xff]  ;;  %v383_v35 = vld [vmem:[%s1548_s2] sm:$0xff]  ;;  %v575_v40 = vld [vmem:[#allocation10 + $0x58] sm:$0xff] }
  0x89   : > { %904 = vmatpush3.msra.mxu0 %v410_v12  ;;  %939 = vmatpush3.msra.mxu1 %v394_v13  ;;  %v578_v37 = vld [vmem:[#allocation10 + $0x70] sm:$0xff]  ;;  %v577_v38 = vld [vmem:[#allocation10 + $0x68] sm:$0xff]  ;;  %v576_v39 = vld [vmem:[#allocation10 + $0x60] sm:$0xff] }
  0x8a   : > { %905 = vmatprep.subr.mxu0 %v1341_v3  ;;  %940 = vmatprep.subr.mxu1 %v1341_v3  ;;  %v574_v41 = vld [vmem:[#allocation10 + $0x50] sm:$0xff]  ;;  %v573_v42 = vld [vmem:[#allocation10 + $0x48] sm:$0xff]  ;;  %v572_v43 = vld [vmem:[#allocation10 + $0x40] sm:$0xff] }
  0x8b   : > { %906 = vmatpush3.msra.mxu0 %v409_v14  ;;  %941 = vmatpush3.msra.mxu1 %v393_v15  ;;  %v571_v44 = vld [vmem:[#allocation10 + $0x38] sm:$0xff]  ;;  %v570_v45 = vld [vmem:[#allocation10 + $0x30] sm:$0xff]  ;;  %v569_v46 = vld [vmem:[#allocation10 + $0x28] sm:$0xff] }
  0x8c   : > { %907 = vmatprep.subr.mxu0 %v1341_v3  ;;  %942 = vmatprep.subr.mxu1 %v1341_v3  ;;  %v568_v47 = vld [vmem:[#allocation10 + $0x20] sm:$0xff]  ;;  %v567_v48 = vld [vmem:[#allocation10 + $0x18] sm:$0xff]  ;;  %v566_v49 = vld [vmem:[#allocation10 + $0x10] sm:$0xff] }
  0x8d   : > { %908 = vmatpush3.msra.mxu0 %v408_v16  ;;  %943 = vmatpush3.msra.mxu1 %v392_v17  ;;  %v565_v50 = vld [vmem:[#allocation10 + $0x8] sm:$0xff]  ;;  %v564_v51 = vld [vmem:[#allocation10] sm:$0xff] }
  0x8e   : > { %909 = vmatprep.subr.mxu0 %v1341_v3  ;;  %944 = vmatprep.subr.mxu1 %v1341_v3  ;;  %v834_v54 = vld [vmem:[%s1675_s4] ss:$0 sm:$0xff] }
  0x8f   : > { %910 = vmatpush3.msra.mxu0 %v407_v18  ;;  %945 = vmatpush3.msra.mxu1 %v391_v19  ;;  %v835_v61 = vld [vmem:[%s1677_s6] ss:$0 sm:$0xff] }
  0x90   : > { %911 = vmatprep.subr.mxu0 %v1341_v3  ;;  %946 = vmatprep.subr.mxu1 %v1341_v3 }
  0x91   : > { %912 = vmatpush3.msra.mxu0 %v406_v20  ;;  %947 = vmatpush3.msra.mxu1 %v390_v21 }
  0x92   : > { %913 = vmatprep.subr.mxu0 %v1341_v3  ;;  %948 = vmatprep.subr.mxu1 %v1341_v3 }
  0x93   : > { %914 = vmatpush3.msra.mxu0 %v405_v22  ;;  %949 = vmatpush3.msra.mxu1 %v389_v23 }
  0x94   : > { %915 = vmatprep.subr.mxu0 %v1341_v3  ;;  %950 = vmatprep.subr.mxu1 %v1341_v3 }
  0x95   : > { %916 = vmatpush3.msra.mxu0 %v404_v24  ;;  %951 = vmatpush3.msra.mxu1 %v388_v25 }
  0x96   : > { %917 = vmatprep.subr.mxu0 %v1341_v3  ;;  %952 = vmatprep.subr.mxu1 %v1341_v3 }
  0x97   : > { %918 = vmatpush3.msra.mxu0 %v403_v26  ;;  %953 = vmatpush3.msra.mxu1 %v387_v27 }
  0x98   : > { %919 = vmatprep.subr.mxu0 %v1341_v3  ;;  %954 = vmatprep.subr.mxu1 %v1341_v3 }
  0x99   : > { %920 = vmatpush3.msra.mxu0 %v402_v28  ;;  %955 = vmatpush3.msra.mxu1 %v386_v29 }
  0x9a   : > { %921 = vmatprep.subr.mxu0 %v1341_v3  ;;  %956 = vmatprep.subr.mxu1 %v1341_v3 }
  0x9b   : > { %922 = vmatpush3.msra.mxu0 %v401_v30  ;;  %957 = vmatpush3.msra.mxu1 %v385_v31 }
  0x9c   : > { %923 = vmatprep.subr.mxu0 %v1341_v3  ;;  %958 = vmatprep.subr.mxu1 %v1341_v3 }
  0x9d   : > { %924 = vmatpush3.msra.mxu0 %v400_v32  ;;  %925 = vmatprep.mubr.msk.f32.mxu0 %vm1342_vm0, %v1341_v3 }
  0x9e   : > { %959 = vmatpush3.msra.mxu1 %v384_v33  ;;  %960 = vmatprep.mubr.msk.f32.mxu1 %vm1342_vm0, %v1341_v3 }
  0x9f   : > { %926 = vmatmul.mubr.f32.vlgmr.msra.gmra.mxu0 %v382_v34  ;;  %961 = vmatmul.mubr.f32.vlgmr.msra.gmra.mxu1 %v383_v35 }
  0xa0   : > { %963 = vmatprep.subr.mxu0 %v1341_v3  ;;  %995 = vmatprep.mubr.msk.f32.mxu0 %vm1342_vm0, %v1341_v3 }
  0xa1   : > { %964 = vmatpush3.msra.mxu0 %v579_v36 }
  0xa2   : > { %965 = vmatprep.subr.mxu0 %v1341_v3 }
  0xa3   : > { %966 = vmatpush3.msra.mxu0 %v578_v37 }
  0xa4   : > { %967 = vmatprep.subr.mxu0 %v1341_v3 }
  0xa5   : > { %968 = vmatpush3.msra.mxu0 %v577_v38 }
  0xa6   : > { %969 = vmatprep.subr.mxu0 %v1341_v3 }
  0xa7   : > { %970 = vmatpush3.msra.mxu0 %v576_v39 }
  0xa8   : > { %971 = vmatprep.subr.mxu0 %v1341_v3 }
  0xa9   : > { %972 = vmatpush3.msra.mxu0 %v575_v40 }
  0xaa   : > { %973 = vmatprep.subr.mxu0 %v1341_v3 }
  0xab   : > { %974 = vmatpush3.msra.mxu0 %v574_v41 }
  0xac   : > { %975 = vmatprep.subr.mxu0 %v1341_v3 }
  0xad   : > { %976 = vmatpush3.msra.mxu0 %v573_v42 }
  0xae   : > { %977 = vmatprep.subr.mxu0 %v1341_v3 }
  0xaf   : > { %978 = vmatpush3.msra.mxu0 %v572_v43 }
  0xb0   : > { %979 = vmatprep.subr.mxu0 %v1341_v3 }
  0xb1   : > { %980 = vmatpush3.msra.mxu0 %v571_v44 }
  0xb2   : > { %981 = vmatprep.subr.mxu0 %v1341_v3 }
  0xb3   : > { %982 = vmatpush3.msra.mxu0 %v570_v45 }
  0xb4   : > { %983 = vmatprep.subr.mxu0 %v1341_v3 }
  0xb5   : > { %984 = vmatpush3.msra.mxu0 %v569_v46 }
  0xb6   : > { %985 = vmatprep.subr.mxu0 %v1341_v3 }
  0xb7   : > { %986 = vmatpush3.msra.mxu0 %v568_v47 }
  0xb8   : > { %987 = vmatprep.subr.mxu0 %v1341_v3 }
  0xb9   : > { %988 = vmatpush3.msra.mxu0 %v567_v48 }
  0xba   : > { %989 = vmatprep.subr.mxu0 %v1341_v3 }
  0xbb   : > { %990 = vmatpush3.msra.mxu0 %v566_v49 }
  0xbc   : > { %991 = vmatprep.subr.mxu0 %v1341_v3 }
  0xbd   : > { %992 = vmatpush3.msra.mxu0 %v565_v50 }
  0xbe   : > { %993 = vmatprep.subr.mxu0 %v1341_v3 }
  0xbf   : > { %994 = vmatpush3.msra.mxu0 %v564_v51 }
 0x15f   : > { %v482_v52 = vpop.f32.mrf.mxu0  ;;  %v552_v53 = vpop.f32.mrf.mxu1 }
 0x160   : > { %v553_v55 = vadd.f32 %v552_v53, %v482_v52 }
 0x161   : > { %v927_v56 = vpop.f32.mrf.mxu0  ;;  %v962_v57 = vpop.f32.mrf.mxu1 }
 0x162   : > { %v563_v58 = vadd.f32 %v834_v54, %v553_v55 }
 0x164   : > { %672 = vst [vmem:[#allocation12] sm:$0xff] %v563_v58  ;;  %996 = vmatmul.mubr.f32.vlgmr.msra.gmra.mxu0 %v563_v58 }
 0x224   : > { %v653_v62 = vpop.f32.mrf.mxu0 }
 0x225   : > { %v654_v63 = vadd.f32 %v835_v61, %v653_v62 }
 0x226   : > { %v997_v0 = vpop.f32.mrf.mxu0 }
 0x227   : > { %v660_v1 = vsel %vm659_vm1, %v654_v63, -1e+30 }
 0x228   : > { %661 = vmax.xlane.f32.xlu0 %v660_v1 }
 0x2b1   : > { %v662_v2 = vpop.xlane.xlu0 %661 }
 0x2b2   : > { %v663_v3 = vsub.f32 %v660_v1, %v662_v2 }
 0x2b4   : > { %v664_v4 = vmul.f32 1.442695, %v663_v3 }
 0x2b6   : > { %1096 = vpow2.f32 %v664_v4 }
 0x2c3   : > { %v1097_v5 = vpop.eup %1096 }
 0x2c4   : > { %666 = vadd.xlane.f32.xlu0 %v1097_v5 }
 0x2c5   : > { %1245 = shalt.err (!%p1242_p13)
}
 0x2c6   : > { %p1706_p1 = pmov %p1705_p10  ;;  %s837_s25 = sshll.u32 %s1411_s11, 7 }
 0x2c7   : > { %s687_s23 = sshll.u32 %s1562_s3, 4  ;;  %s685_s2 = scalar_lea.hbm %s1678_s7, %s837_s25  ;;  %s688_s23 = int_to_ptr.vmem [resolvable:$true] %s687_s23 }
 0x2c8   : > { %1018 = dma.vmem_to_hbm [thread:$0]  (%p1706_p1), %s699_s21, 128, %s1679_s8, [#allocation13]  }
 0x2c9   : > { %s674_s12 = scalar_lea.sflag [#allocation4], %s1544_s1  ;;  %s1256_s22 = scalar_lea.vmem %s688_s23, 128 }
 0x2ca   : > { %p1257_p3 = scmp.ne.s32.totalorder %s688_s23, %s1256_s22  ;;  %p1707_p4 = scmp.ne.s32.totalorder %s1695_s26, 0 }
 0x2cb   : > { %s1344_s18 = smov [#allocation11]  }
 0x2cc   : > { %p1258_p6 = pnand %p1257_p3, %p1707_p4  ;;  %s1260_s15 = sshll.u32 %s1344_s18, 4  ;;  %s1261_s15 = int_to_ptr.vmem [resolvable:$false] %s1260_s15 }
 0x2cd   : > { %s1262_s20 = scalar_lea.vmem %s1261_s15, 256  ;;  %p1263_p8 = scmp.lt.s32.totalorder %s688_s23, %s1261_s15 }
 0x2ce   : > { %p1259_p5 = pneg %p1258_p6  ;;  %p1264_p7 = scmp.lt.s32.totalorder %s1262_s20, %s1256_s22 }
 0x2d0   : > { %p1265_p10 = por %p1264_p7, %p1263_p8 }
 0x2d2   : > { %p1266_p0 = pnand %p1265_p10, %p1259_p5 }
 0x34d   : > { %v667_v6 = vpop.xlane.xlu0 %666 }
 0x34e   : > { %1098 = vlog2.f32 %v667_v6 }
 0x35b   : > { %v1099_v7 = vpop.eup %1098 }
 0x35c   : > { %v669_v8 = vmul.f32 0.6931472, %v1099_v7 }
 0x35e   : > { %v670_v9 = vsub.f32 %v663_v3, %v669_v8 }
 0x360   : > { %671 = vst [vmem:[%s1562_s3] sm:$0xff] %v670_v9 }
 0x361   : > { %1269 = shalt.err (!%p1266_p0)
}
 0x362   : > { %s1270_s21 = scalar_lea.hbm %s685_s2, 128  ;;  %s1274_s16 = scalar_lea.hbm %s1678_s7, 1024 }
 0x363   : > { %p1271_p12 = scmp.ne.s32.totalorder %s685_s2, %s1270_s21  ;;  %p1275_p11 = scmp.lt.s32.totalorder %s685_s2, %s1678_s7 }
 0x364   : > { %p1276_p13 = scmp.lt.s32.totalorder %s1274_s16, %s1270_s21 }
 0x365   : > { %p1272_p2 = pnand %p1271_p12, %p1707_p4 }
 0x366   : > { %p1277_p1 = por %p1276_p13, %p1275_p11 }
 0x367   : > { %p1273_p9 = pneg %p1272_p2 }
 0x369   : > { %p1278_p3 = pnand %p1277_p1, %p1273_p9 }
 0x36b   : > { %1281 = shalt.err (!%p1278_p3)
}
 0x36c   : > { %1016 = dma.vmem_to_hbm [thread:$0]  (%p1707_p4), %s688_s23, 128, %s685_s2, %s674_s12  }
 0x36d   : > { %p1708_p6 = scmp.eq.s32.totalorder %s1411_s11, 7 }
 0x36f   : > { %1311 = dma.done.wait (%p1708_p6), [#allocation13], 128   ;;  %p1709_p5 = pmov %p1708_p6 }
 0x371   : > { %1313 = vsyncadd (%p1709_p5), [#allocation13], 4294967168 }
 0x372 PF: > { %p1054_p8 = scmp.ge.s32.totalorder %s1332_s30, 2  ;;  %s714_s25 = sand.u32 1, %s1320_s27  }
 0x373   : > { %p1710_p7 = scmp.ne.s32.totalorder %s1696_s9, 0  ;;  %s715_s13 = scalar_lea.sflag [#allocation4], %s714_s25 }
 0x375   : > { %p1040_p10 = pnand %p1054_p8, %p1710_p7 }
 0x377   : > { %p1041_p0 = pneg %p1040_p10 }
 0x379   : > { %1315 = dma.done.wait (%p1041_p0), %s715_s13, 128  }
 0x37a   : > { %1317 = vsyncadd (%p1041_p0), %s715_s13, 4294967168  ;;  %p25_p4 = scmp.ge.s32.totalorder %s1479_s17, 10   ;;  %s1711_s27 = smov %s1324_s28 }
 0x37b   : > { %s1712_s28 = smov %s1328_s29  ;;  %s1713_s29 = smov %s1490_s24 }
 0x37c   : > { %s1714_s30 = smov %s1479_s17  ;;  %27 = sbr.rel (!%p25_p4) target bundleno = 12 (0xc), region = 121 }
 0x381   :  { %720 = vsyncpa [#allocation3], 1 }
 0x382   :  { %722 = vsyncpa [#allocation3 + $0x1], 1 }
 0x383   :  { %723 = vsyncpa [#allocation6], 1 }
 0x384   :  { %724 = vsyncpa [#allocation9], 1 }
 0x385   :  { %725 = vsyncpa [#allocation4], 1 }
 0x386   :  { %727 = vsyncpa [#allocation4 + $0x1], 1 }
 0x387   :  { %728 = vsyncpa [#allocation13], 1 }

</bundles_post_ra>
